<compile_context>
chip_gen: v6e
topology: v6e:2x2x1
jax: 0.10.0
libtpu: 0.0.40
codegen_flags: <defaults>
</compile_context>

<pallas_src>
import math

import jax
import jax.numpy as jnp
from jax.experimental import pallas as pl
from jax.experimental.pallas import tpu as pltpu


_SQRT_2_OVER_PI = 0.7978845608028654


def _ffn_kernel(x_ref, w1_ref, b1_ref, w2_ref, b2_ref, o_ref, acc_ref):
    """Fused Linear -> GELU -> Linear for one (tm, dim) row tile x one hidden tile.

    Grid is (grid_m, grid_h); grid axis 1 walks the hidden dimension.

    x_ref : (tm, dim)        activations, bf16 (cast in the wrapper)
    w1_ref: (dim, th)        first linear weight block, (in, out) layout, bf16
    b1_ref: (1, th)          first linear bias block, f32
    w2_ref: (th, out_pad)    second linear weight block, (in, out) layout, bf16
    b2_ref: (1, out_pad)     second linear bias, f32
    o_ref : (tm, out_pad)    output tile (lane-dense: out_pad % 128 == 0)
    acc_ref: (tm, out_pad)   f32 accumulator scratch, resident across the hidden axis
    """
    k = pl.program_id(1)

    @pl.when(k == 0)
    def _():
        acc_ref[...] = jnp.zeros_like(acc_ref)

    # First projection for this hidden block: bf16 operands on the MXU, f32 accumulation.
    h = jnp.dot(x_ref[...], w1_ref[...], preferred_element_type=jnp.float32)
    h = h + b1_ref[...]                       # (1, th) broadcasts over rows

    # GELU in f32 (tanh approximation; < ~3e-3 from exact erf-GELU).  tanh uses the
    # EUP slot, so it overlaps with MXU/VPU work.
    h = 0.5 * h * (1.0 + jnp.tanh(_SQRT_2_OVER_PI * (h + 0.044715 * (h * h * h))))

    # TODO(synk): nn.Dropout is identity in eval/inference mode; training-time
    # stochastic masking is not implemented here.

    # Second projection for this hidden block, accumulated over the hidden axis.
    acc_ref[...] += jnp.dot(h.astype(w2_ref.dtype), w2_ref[...],
                            preferred_element_type=jnp.float32)

    @pl.when(k == pl.num_programs(1) - 1)
    def _():
        o_ref[...] = (acc_ref[...] + b2_ref[...]).astype(o_ref.dtype)


def _round_up(a, b):
    return ((a + b - 1) // b) * b


def feedforward_pallas(x, w1, b1, w2, b2, *, block_m=None, block_h=512,
                       compute_dtype=jnp.bfloat16):
    """FeedForward forward: Linear(dim->hidden) -> GELU -> Linear(hidden->out).

    x: (..., dim).  Weights are stored (in_features, out_features), i.e. transposed
    relative to torch.  Pass weights already cast to `compute_dtype` to avoid a
    per-call cast (done once in __main__).  Dropout is treated as identity (eval mode).
    """
    *lead, dim = x.shape
    hidden = w1.shape[1]
    out_dim = w2.shape[1]
    assert w1.shape == (dim, hidden)
    assert w2.shape == (hidden, out_dim)
    assert b1.shape == (hidden,)
    assert b2.shape == (out_dim,)

    out_dtype = x.dtype
    out_itemsize = jnp.dtype(out_dtype).itemsize

    # --- generation-aware tile sizing -------------------------------------------------
    try:
        vmem_cap = int(pltpu.get_tpu_info().vmem_capacity_bytes)
    except Exception:
        vmem_cap = 64 << 20                    # conservative (v7x) fallback
    if block_m is None:
        block_m = 512 if vmem_cap > (64 << 20) else 256

    # --- collapse leading dims, cast activations once in the wrapper -------------------
    x2 = x.reshape(-1, dim).astype(compute_dtype)
    m = x2.shape[0]

    # --- lane-dense output padding ------------------------------------------------------
    lane = 128
    out_pad = _round_up(out_dim, lane)
    w2c = w2 if w2.dtype == compute_dtype else w2.astype(compute_dtype)
    b2f = b2.astype(jnp.float32)
    if out_pad != out_dim:
        w2c = jnp.pad(w2c, ((0, 0), (0, out_pad - out_dim)))
        b2f = jnp.pad(b2f, (0, out_pad - out_dim))

    # --- hidden-dimension tiling --------------------------------------------------------
    # th is a multiple of 256 (v6e/v7x MXU is 2x256x256) unless hidden is small enough
    # to take in one block (then th == full hidden, which satisfies the layout rule).
    w1c = w1 if w1.dtype == compute_dtype else w1.astype(compute_dtype)
    b1f = b1.astype(jnp.float32)
    block_h = max(256, _round_up(block_h, 256))
    if hidden <= block_h:
        th = hidden
        hid_pad = hidden
    else:
        th = block_h
        hid_pad = _round_up(hidden, th)
        if hid_pad != hidden:
            # zero-padded hidden columns/rows contribute exactly zero to the output
            w1c = jnp.pad(w1c, ((0, 0), (0, hid_pad - hidden)))
            b1f = jnp.pad(b1f, (0, hid_pad - hidden))
            w2c = jnp.pad(w2c, ((0, hid_pad - hidden), (0, 0)))
    grid_h = hid_pad // th

    # --- M tiling (>= 2 tiles when possible so both v7x TensorCores get work) ----------
    tm = min(block_m, _round_up(m, 8))
    if _round_up(m, tm) == tm and tm > 8:      # would be a single M tile -> split
        tm = _round_up((tm + 1) // 2, 8)
    m_pad = _round_up(m, tm)
    if m_pad != m:
        x2 = jnp.pad(x2, ((0, m_pad - m), (0, 0)))
    grid_m = m_pad // tm

    b1_2d = b1f.reshape(1, hid_pad)
    b2_2d = b2f.reshape(1, out_pad)

    # --- explicit scoped-VMEM budget (per-step tiles, double-buffered where streamed) ---
    vmem_need = (
        2 * tm * dim * 2            # x tile (bf16), double-buffered
        + 2 * dim * th * 2          # w1 block (bf16), double-buffered along hidden axis
        + 2 * max(th, 128) * 4      # b1 block (f32)
        + 2 * th * out_pad * 2      # w2 block (bf16), double-buffered along hidden axis
        + 2 * out_pad * 4           # b2 (f32)
        + 2 * tm * out_pad * out_itemsize   # output tile, double-buffered
        + tm * out_pad * 4          # f32 accumulator scratch
        + tm * th * 4               # f32 GELU intermediate (compiler temporary)
    )
    vmem_limit = min(vmem_cap, max(vmem_need + (4 << 20), 16 << 20))

    flops = 2 * m_pad * dim * hid_pad + 2 * m_pad * hid_pad * out_pad
    bytes_accessed = (x2.size * x2.dtype.itemsize
                      + w1c.size * w1c.dtype.itemsize
                      + w2c.size * w2c.dtype.itemsize
                      + b1_2d.size * 4 + b2_2d.size * 4
                      + m_pad * out_pad * out_itemsize)

    out = pl.pallas_call(
        _ffn_kernel,
        out_shape=jax.ShapeDtypeStruct((m_pad, out_pad), out_dtype),
        grid_spec=pltpu.PrefetchScalarGridSpec(
            num_scalar_prefetch=0,
            grid=(grid_m, grid_h),
            in_specs=[
                pl.BlockSpec((tm, dim), lambda i, k: (i, 0)),
                pl.BlockSpec((dim, th), lambda i, k: (0, k)),
                pl.BlockSpec((1, th), lambda i, k: (0, k)),
                pl.BlockSpec((th, out_pad), lambda i, k: (k, 0)),
                pl.BlockSpec((1, out_pad), lambda i, k: (0, 0)),
            ],
            out_specs=pl.BlockSpec((tm, out_pad), lambda i, k: (i, 0)),
            scratch_shapes=[pltpu.VMEM((tm, out_pad), jnp.float32)],
        ),
        compiler_params=pltpu.CompilerParams(
            dimension_semantics=("parallel", "arbitrary"),
            vmem_limit_bytes=int(vmem_limit)),
        cost_estimate=pl.CostEstimate(
            flops=flops,
            transcendentals=m_pad * hid_pad,     # one tanh per hidden element
            bytes_accessed=int(bytes_accessed)),
    )(x2, w1c, b1_2d, w2c, b2_2d)

    return out[:m, :out_dim].reshape(*lead, out_dim)


def feedforward_reference(x, w1, b1, w2, b2):
    """Pure-JAX mirror of the PyTorch forward (eval mode, exact erf-GELU)."""
    h = jnp.einsum('...d,dh->...h', x, w1) + b1
    h = jax.nn.gelu(h, approximate=False)
    return jnp.einsum('...h,ho->...o', h, w2) + b2


if __name__ == "__main__":
    # Small shapes consistent with the module: batch=2, seq=8, dim=32, out_dim=32.
    B, N, DIM, OUT_DIM = 2, 8, 32, 32

    key = jax.random.PRNGKey(0)
    kx, k1, kb1, k2, kb2 = jax.random.split(key, 5)
    x = jax.random.normal(kx, (B, N, DIM), dtype=jnp.float32)
    # Weights stored as (in_features, out_features).
    w1 = jax.random.normal(k1, (DIM, OUT_DIM), dtype=jnp.float32) / math.sqrt(DIM)
    b1 = jax.random.normal(kb1, (OUT_DIM,), dtype=jnp.float32) * 0.01
    w2 = jax.random.normal(k2, (OUT_DIM, OUT_DIM), dtype=jnp.float32) / math.sqrt(OUT_DIM)
    b2 = jax.random.normal(kb2, (OUT_DIM,), dtype=jnp.float32) * 0.01

    # Pre-cast weights once (what an inference setup would cache at init time) so the
    # kernel wrapper does no per-call f32->bf16 HBM round trip.
    w1_c = w1.astype(jnp.bfloat16)
    w2_c = w2.astype(jnp.bfloat16)

    out = feedforward_pallas(x, w1_c, b1, w2_c, b2)
    out = jax.block_until_ready(out)

    ref = feedforward_reference(x, w1, b1, w2, b2)
    assert out.shape == ref.shape == (B, N, OUT_DIM)
    assert jnp.allclose(out, ref, rtol=2e-2, atol=2e-2), "mismatch vs reference"

    print("KERNEL_OK")
</pallas_src>

<mosaic_0001>
module attributes {stable_mosaic.version = 11 : i64} {
  func.func @_ffn_kernel(%arg0: i32, %arg1: i32, %arg2: memref<8x32xbf16, #tpu.memory_space<vmem>>, %arg3: memref<32x32xbf16, #tpu.memory_space<vmem>>, %arg4: memref<1x32xf32, #tpu.memory_space<vmem>>, %arg5: memref<32x128xbf16, #tpu.memory_space<vmem>>, %arg6: memref<1x128xf32, #tpu.memory_space<vmem>>, %arg7: memref<8x128xf32, #tpu.memory_space<vmem>>, %arg8: memref<8x128xf32, #tpu.memory_space<vmem>>) attributes {dimension_semantics = [#tpu.dimension_semantics<parallel>, #tpu.dimension_semantics<arbitrary>], iteration_bounds = array<i64: 2, 1>, scalar_prefetch = 0 : i64, scratch_operands = 1 : i64, tpu.core_type = #tpu.core_type<tc>, window_params = [{transform_indices = @transform_0, window_bounds = array<i64: 8, 32>}, {transform_indices = @transform_1, window_bounds = array<i64: 32, 32>}, {transform_indices = @transform_2, window_bounds = array<i64: 1, 32>}, {transform_indices = @transform_3, window_bounds = array<i64: 32, 128>}, {pipeline_mode = #tpu.pipeline_mode<synchronous>, transform_indices = @transform_4, window_bounds = array<i64: 1, 128>}, {transform_indices = @transform_5, window_bounds = array<i64: 8, 128>}]} {
    %c0_i32 = arith.constant 0 : i32
    %0 = arith.cmpi eq, %arg1, %c0_i32 : i32
    %1 = arith.extui %0 : i1 to i32
    %c0_i32_0 = arith.constant 0 : i32
    %2 = arith.cmpi ne, %1, %c0_i32_0 : i32
    scf.if %2 {
      %cst_19 = arith.constant 0.000000e+00 : f32
      %31 = vector.broadcast %cst_19 : f32 to vector<8x128xf32>
      %c0_20 = arith.constant 0 : index
      %c0_21 = arith.constant 0 : index
      %32 = vector.load %arg8[%c0_20, %c0_21] : memref<8x128xf32, #tpu.memory_space<vmem>>, vector<8x128xf32>
      tpu.vector_store %arg8[%c0_20, %c0_21], %31 {strides = array<i32>} : memref<8x128xf32, #tpu.memory_space<vmem>>, vector<8x128xf32>,
    } else {
    }
    %c0 = arith.constant 0 : index
    %c0_1 = arith.constant 0 : index
    %3 = vector.load %arg2[%c0, %c0_1] : memref<8x32xbf16, #tpu.memory_space<vmem>>, vector<8x32xbf16>
    %c0_2 = arith.constant 0 : index
    %c0_3 = arith.constant 0 : index
    %4 = vector.load %arg3[%c0_2, %c0_3] : memref<32x32xbf16, #tpu.memory_space<vmem>>, vector<32x32xbf16>
    %cst = arith.constant dense<0.000000e+00> : vector<8x32xf32>
    %5 = tpu.matmul %3, %4, %cst {dimension_numbers = #tpu.dot_dimension_numbers<[1], [0], [0], [1], [0, 0, 1, 1], [], []>} : vector<8x32xbf16>, vector<32x32xbf16>, vector<8x32xf32> -> vector<8x32xf32>
    %c0_4 = arith.constant 0 : index
    %c0_5 = arith.constant 0 : index
    %6 = vector.load %arg4[%c0_4, %c0_5] : memref<1x32xf32, #tpu.memory_space<vmem>>, vector<1x32xf32>
    %7 = vector.broadcast %6 : vector<1x32xf32> to vector<8x32xf32>
    %8 = arith.addf %5, %7 : vector<8x32xf32>
    %cst_6 = arith.constant 5.000000e-01 : f32
    %9 = vector.broadcast %cst_6 : f32 to vector<8x32xf32>
    %10 = arith.mulf %9, %8 : vector<8x32xf32>
    %11 = arith.mulf %8, %8 : vector<8x32xf32>
    %12 = arith.mulf %11, %8 : vector<8x32xf32>
    %cst_7 = arith.constant 4.471500e-02 : f32
    %13 = vector.broadcast %cst_7 : f32 to vector<8x32xf32>
    %14 = arith.mulf %13, %12 : vector<8x32xf32>
    %15 = arith.addf %8, %14 : vector<8x32xf32>
    %cst_8 = arith.constant 0.797884583 : f32
    %16 = vector.broadcast %cst_8 : f32 to vector<8x32xf32>
    %17 = arith.mulf %16, %15 : vector<8x32xf32>
    %18 = math.tanh %17 : vector<8x32xf32>
    %cst_9 = arith.constant 1.000000e+00 : f32
    %19 = vector.broadcast %cst_9 : f32 to vector<8x32xf32>
    %20 = arith.addf %19, %18 : vector<8x32xf32>
    %21 = arith.mulf %10, %20 : vector<8x32xf32>
    %c0_10 = arith.constant 0 : index
    %c0_11 = arith.constant 0 : index
    %22 = vector.load %arg8[%c0_10, %c0_11] : memref<8x128xf32, #tpu.memory_space<vmem>>, vector<8x128xf32>
    %23 = arith.truncf %21 : vector<8x32xf32> to vector<8x32xbf16>
    %c0_12 = arith.constant 0 : index
    %c0_13 = arith.constant 0 : index
    %24 = vector.load %arg5[%c0_12, %c0_13] : memref<32x128xbf16, #tpu.memory_space<vmem>>, vector<32x128xbf16>
    %cst_14 = arith.constant dense<0.000000e+00> : vector<8x128xf32>
    %25 = tpu.matmul %23, %24, %cst_14 {dimension_numbers = #tpu.dot_dimension_numbers<[1], [0], [0], [1], [0, 0, 1, 1], [], []>} : vector<8x32xbf16>, vector<32x128xbf16>, vector<8x128xf32> -> vector<8x128xf32>
    %26 = arith.addf %22, %25 : vector<8x128xf32>
    %c0_15 = arith.constant 0 : index
    %c0_16 = arith.constant 0 : index
    %27 = vector.load %arg8[%c0_15, %c0_16] : memref<8x128xf32, #tpu.memory_space<vmem>>, vector<8x128xf32>
    tpu.vector_store %arg8[%c0_15, %c0_16], %26 {strides = array<i32>} : memref<8x128xf32, #tpu.memory_space<vmem>>, vector<8x128xf32>,
    %c0_i32_17 = arith.constant 0 : i32
    %28 = arith.cmpi eq, %arg1, %c0_i32_17 : i32
    %29 = arith.extui %28 : i1 to i32
    %c0_i32_18 = arith.constant 0 : i32
    %30 = arith.cmpi ne, %29, %c0_i32_18 : i32
    scf.if %30 {
      %c0_19 = arith.constant 0 : index
      %c0_20 = arith.constant 0 : index
      %31 = vector.load %arg8[%c0_19, %c0_20] : memref<8x128xf32, #tpu.memory_space<vmem>>, vector<8x128xf32>
      %c0_21 = arith.constant 0 : index
      %c0_22 = arith.constant 0 : index
      %32 = vector.load %arg6[%c0_21, %c0_22] : memref<1x128xf32, #tpu.memory_space<vmem>>, vector<1x128xf32>
      %33 = vector.broadcast %32 : vector<1x128xf32> to vector<8x128xf32>
      %34 = arith.addf %31, %33 : vector<8x128xf32>
      %c0_23 = arith.constant 0 : index
      %c0_24 = arith.constant 0 : index
      %35 = vector.load %arg7[%c0_23, %c0_24] : memref<8x128xf32, #tpu.memory_space<vmem>>, vector<8x128xf32>
      tpu.vector_store %arg7[%c0_23, %c0_24], %34 {strides = array<i32>} : memref<8x128xf32, #tpu.memory_space<vmem>>, vector<8x128xf32>,
    } else {
    }
    return
  }
  func.func @transform_0(%arg0: i32, %arg1: i32) -> (i32, i32) {
    %c0_i32 = arith.constant 0 : i32
    %c0_i32_0 = arith.constant 0 : i32
    return %arg0, %c0_i32 : i32, i32
  }
  func.func @transform_1(%arg0: i32, %arg1: i32) -> (i32, i32) {
    %c0_i32 = arith.constant 0 : i32
    %c0_i32_0 = arith.constant 0 : i32
    return %c0_i32, %arg1 : i32, i32
  }
  func.func @transform_2(%arg0: i32, %arg1: i32) -> (i32, i32) {
    %c0_i32 = arith.constant 0 : i32
    %c0_i32_0 = arith.constant 0 : i32
    return %c0_i32, %arg1 : i32, i32
  }
  func.func @transform_3(%arg0: i32, %arg1: i32) -> (i32, i32) {
    %c0_i32 = arith.constant 0 : i32
    %c0_i32_0 = arith.constant 0 : i32
    return %arg1, %c0_i32 : i32, i32
  }
  func.func @transform_4(%arg0: i32, %arg1: i32) -> (i32, i32) {
    %c0_i32 = arith.constant 0 : i32
    %c0_i32_0 = arith.constant 0 : i32
    %c0_i32_1 = arith.constant 0 : i32
    return %c0_i32, %c0_i32_0 : i32, i32
  }
  func.func @transform_5(%arg0: i32, %arg1: i32) -> (i32, i32) {
    %c0_i32 = arith.constant 0 : i32
    %c0_i32_0 = arith.constant 0 : i32
    return %arg0, %c0_i32 : i32, i32
  }
}

</mosaic_0001>

<bundles_post_ra>
// kernel: tpu_custom_call.1
= control target key start
LH: loop header
LB: loop body
LE: loop exit
PB: predicated region body
PF: predicated region fallthrough
CT: control target
= control target key end

     0   :  { %s1137_s0 = inlined_call_operand.hbm [shape: bf16[16,32], index: 0, kind: input, shape index: {}]   ;;  %s1138_s1 = inlined_call_operand.hbm [shape: bf16[32,32], index: 1, kind: input, shape index: {}]   ;;  %s1139_s2 = inlined_call_operand.vmem [shape: f32[1,32], index: 2, kind: input, shape index: {}]   ;;  %s1140_s3 = inlined_call_operand.hbm [shape: bf16[32,128], index: 3, kind: input, shape index: {}]   ;;  %s1141_s4 = inlined_call_operand.vmem [shape: f32[1,128], index: 4, kind: input, shape index: {}]   ;;  %s1142_s5 = inlined_call_operand.hbm [shape: f32[16,128], index: 5, kind: output, shape index: {}]  }
   0x1   :  { %1146 = sst [smem:[#allocation13_spill]] %s1138_s1 }
   0x2   :  { %10 = vsyncpa [#allocation4], 0 }
   0x3   :  { %12 = vsyncpa [#allocation4 + $0x1], 0 }
   0x4   :  { %13 = vsyncpa [#allocation7], 0 }
   0x5   :  { %14 = vsyncpa [#allocation5], 0 }
   0x6   :  { %16 = vsyncpa [#allocation5 + $0x1], 0  ;;  %s942_s18 = smov 0   ;;  %s944_s19 = smov 0  }
   0x7   :  { %s946_s20 = smov 0   ;;  %s948_s21 = smov 0  }
   0x8   :  { %s950_s22 = smov 0   ;;  %s952_s23 = smov 0  }
   0x9 LB: > { %s597_s24 = sadd.s32 4294967295, %s902_s23   ;;  %s598_s25 = sadd.s32 4294967294, %s902_s23   ;;  %s902_s23 = sphi %s952_s23, %s22_s23   ;;  %s898_s22 = sphi %s950_s22, %s1164_s22   ;;  %s894_s21 = sphi %s948_s21, %s1163_s21   ;;  %s890_s20 = sphi %s946_s20, %s1162_s20   ;;  %s886_s19 = sphi %s944_s19, %s1161_s19   ;;  %s882_s18 = sphi %s942_s18, %s1160_s18  }
   0xa   : > { %p54_p0 = scmp.ne.s32.totalorder %s886_s19, %s882_s18  ;;  %p976_p1 = scmp.eq.s32.totalorder %s597_s24, 0 }
   0xb   : > { %p980_p2 = scmp.eq.s32.totalorder %s597_s24, 1  ;;  %p183_p3 = scmp.eq.s32.totalorder %s598_s25, 1 }
   0xc   : > { %s1147_s26 = scalar_select %p976_p1, 1, 0 }
   0xd   : > { %p986_p4 = por %p976_p1, %p54_p0  ;;  %p599_p5 = scmp.ge.s32.totalorder %s902_s23, 1 }
   0xe   : > { %p991_p6 = por %p183_p3, %p54_p0  ;;  %p190_p7 = scmp.lt.s32.totalorder %s902_s23, 3 }
   0xf   : > { %s1149_s28 = scalar_select %p986_p4, 1, 0 }
  0x10   : > { %s1150_s29 = scalar_select %p991_p6, 1, 0 }
  0x11   : > { %p996_p8 = pnand %p599_p5, %p190_p7  ;;  %s904_s6 = smov [#allocation6]  }
  0x12   : > { %s204_s7 = sshll.u32 %s904_s6, 4  ;;  %s905_s9 = smov [#allocation8]   ;;  %s205_s7 = int_to_ptr.vmem [resolvable:$true] %s204_s7 }
  0x13   : > { %p657_p9 = pneg %p996_p8  ;;  %s226_s10 = sshll.u32 %s905_s9, 4  ;;  %s227_s10 = int_to_ptr.vmem [resolvable:$true] %s226_s10 }
  0x14   : > { %s749_s11 = scalar_lea.vmem %s205_s7, 256  ;;  %p757_p5 = scmp.lt.s32.totalorder %s205_s7, %s205_s7 }
  0x15   : > { %p1005_p11 = pnand %p657_p9, %p976_p1  ;;  %p750_p13 = scmp.ne.s32.totalorder %s205_s7, %s749_s11 }
  0x16   : > { %p758_p7 = scmp.lt.s32.totalorder %s749_s11, %s749_s11 }
  0x17   : > { %p740_p12 = pneg %p1005_p11 }
  0x18   : > { %p759_p10 = por %p758_p7, %p757_p5 }
  0x19   : > { %p752_p0 = pnand %p750_p13, %p740_p12 }
  0x1b   : > { %p753_p3 = pneg %p752_p0 }
  0x1d   : > { %p760_p9 = pnand %p759_p10, %p753_p3 }
  0x1f   : > { %763 = shalt.err (!%p760_p9)
}
  0x20   : > { %s906_s12 = smov 64   ;;  %s907_s13 = smov 4  }
  0x21   : > { %s1153_s1 = sld [smem:[#allocation13_spill]]  ;;  %s775_s16 = scalar_lea.vmem %s227_s10, 256 }
  0x22   : > { %p776_p6 = scmp.ne.s32.totalorder %s227_s10, %s775_s16  ;;  %p783_p1 = scmp.lt.s32.totalorder %s227_s10, %s227_s10 }
  0x23   : > { %p784_p4 = scmp.lt.s32.totalorder %s775_s16, %s775_s16 }
  0x24   : > { %p778_p13 = pnand %p776_p6, %p740_p12 }
  0x25   : > { %p785_p5 = por %p784_p4, %p783_p1 }
  0x26   : > { %p779_p0 = pneg %p778_p13 }
  0x27   : > { %660 = dma.hbm_to_vmem [thread:$0]  (!%p1005_p11), %s1153_s1, 256, %s205_s7, [#allocation7], %s906_s12, %s906_s12, %s907_s13  }
  0x28   : > { %p786_p10 = pnand %p785_p5, %p779_p0 }
  0x2a   : > { %789 = shalt.err (!%p786_p10)
}
  0x2b   : > { %663 = dma.hbm_to_vmem [thread:$0]  (!%p1005_p11), %s1140_s3, 256, %s227_s10, [#allocation7], %s906_s12, %s906_s12, %s907_s13  }
  0x2c   : > { %s34_s25 = sadd.s32 1, %s898_s22  ;;  %s41_s6 = sadd.s32 1, %s890_s20 }
  0x2d   : > { %p36_p1 = scmp.ge.s32.totalorder %s34_s25, 2  ;;  %p48_p4 = scmp.ne.s32.totalorder %s890_s20, %s886_s19 }
  0x2e   : > { %p49_p6 = scmp.eq.s32.totalorder %s902_s23, 0  ;;  %p674_p12 = scmp.lt.s32.totalorder %s902_s23, 2 }
  0x2f   : > { %s1166_s25 = smov (%p36_p1, %s34_s25), 0  ;;  %p1037_p7 = por %p980_p2, %p48_p4 }
  0x30   : > { %p50_p3 = por %p49_p6, %p48_p4  ;;  %s38_s8 = ssub.s32 %s898_s22, %s1166_s25 }
  0x31   : > { %s243_s9 = sand.u32 1, %s890_s20   ;;  %p39_p9 = scmp.eq.s32.totalorder %s38_s8, 0 }
  0x32   : > { %s604_s10 = sshll.u32 %s243_s9, 2  ;;  %s605_s11 = sshll.u32 %s898_s22, 6 }
  0x33   : > { %s1046_s12 = scalar_select %p39_p9, %s890_s20, %s41_s6  }
  0x34   : > { %s252_s15 = scalar_lea.hbm %s1137_s0, %s605_s11  ;;  %s247_s16 = scalar_lea.vmem [#allocation3], %s604_s10 }
  0x35   : > { %s254_s17 = sshll.u32 %s247_s16, 4  ;;  %p1053_p11 = pnand %p674_p12, %p50_p3  ;;  %s255_s17 = int_to_ptr.vmem [resolvable:$true] %s254_s17 }
  0x36   : > { %s244_s24 = scalar_lea.sflag [#allocation4], %s243_s9  ;;  %s803_s8 = scalar_lea.vmem %s255_s17, 64 }
  0x37   : > { %p792_p2 = pneg %p1053_p11  ;;  %p804_p13 = scmp.ne.s32.totalorder %s255_s17, %s803_s8 }
  0x38   : > { %s908_s6 = smov [#allocation3]  }
  0x39   : > { %p806_p0 = pnand %p804_p13, %p792_p2  ;;  %s808_s1 = sshll.u32 %s908_s6, 4  ;;  %s809_s1 = int_to_ptr.vmem [resolvable:$false] %s808_s1 }
  0x3a   : > { %s810_s11 = scalar_lea.vmem %s809_s1, 128  ;;  %p811_p10 = scmp.lt.s32.totalorder %s255_s17, %s809_s1 }
  0x3b   : > { %p807_p5 = pneg %p806_p0  ;;  %p812_p1 = scmp.lt.s32.totalorder %s810_s11, %s803_s8 }
  0x3d   : > { %p813_p4 = por %p812_p1, %p811_p10 }
  0x3f   : > { %p814_p6 = pnand %p813_p4, %p807_p5 }
  0x41   : > { %817 = shalt.err (!%p814_p6)
}
  0x42   : > { %667 = dma.hbm_to_vmem [thread:$0]  (!%p1053_p11), %s252_s15, 64, %s255_s17, %s244_s24  }
  0x43   : > { %263 = sbr.rel (%p996_p8) target bundleno = 520 (0x208), region = 40  ;;  %s1064_s9 = sand.u32 (!%p996_p8), 1, %s886_s19  }
  0x44   : > { %s607_s10 = sshll.u32 (!%p996_p8), %s1064_s9, 2  ;;  %s266_s13 = scalar_lea.sflag (!%p996_p8), [#allocation4], %s1064_s9 }
  0x45   : > { %s269_s14 = scalar_lea.vmem (!%p996_p8), [#allocation3], %s607_s10  ;;  %p1156_p12 = scmp.ne.s32.totalorder (!%p996_p8), %s1149_s28, 0 }
  0x48   : > { %869 = dma.done.wait (%p1156_p12), %s266_s13, 64  }
  0x49   : > { %871 = vsyncadd (%p1156_p12), %s266_s13, 4294967232  ;;  %p1157_p3 = scmp.ne.s32.totalorder %s1147_s26, 0 }
  0x4b   : > { %873 = dma.done.wait (%p1157_p3), [#allocation7], 512  }
  0x4c   : > { %875 = vsyncadd (%p1157_p3), [#allocation7], 4294966784  ;;  %v909_v0 = vmov 0.0   ;;  %vm910_vm0 = vmmov 0   ;;  %v732_v1 = vld [vmem:[#allocation6 + $0x8] sm:$0xff]   ;;  %v733_v2 = vld [vmem:[#allocation6] sm:$0xff]  }
  0x4d   : > { %629 = vmatprep.subr.bf16.mxu0 %v909_v0  ;;  %633 = vmatprep.mubr.msk.bf16.mxu0 %vm910_vm0, %v909_v0  ;;  %v317_v3 = vld [vmem:[%s269_s14] sm:$0xf]  ;;  %vm341_vm1 = vcmask 261120   ;;  %v735_v5 = vld [vmem:[#allocation8] sm:$0xff]   ;;  %s610_s28 = sshll.u32 %s1064_s9, 3  ;;  %s620_s16 = sshll.u32 %s894_s21, 7 }
  0x4e   : > { %637 = vmatprep.subr.bf16.mxu1 %v909_v0  ;;  %641 = vmatprep.mubr.msk.bf16.mxu1 %vm910_vm0, %v909_v0  ;;  %v734_v4 = vld [vmem:[#allocation8 + $0x8] sm:$0xff]   ;;  %s306_s17 = scalar_lea.vmem [#allocation9], %s610_s28  ;;  %s1089_s6 = scalar_lea.hbm %s1142_s5, %s620_s16 }
  0x4f   : > { %630 = vmatpush3.bf16.msra.mxu0 %v732_v1  ;;  %638 = vmatpush3.bf16.msra.mxu1 %v734_v4  ;;  %v611_v6 = vld [vmem:[%s1139_s2] ss:$0 sm:$0xff]  ;;  %s484_s27 = sshll.u32 %s306_s17, 4  ;;  %s471_s11 = scalar_lea.sflag [#allocation5], %s1064_s9  ;;  %s1091_s27 = int_to_ptr.vmem [resolvable:$true] %s484_s27 }
  0x50   : > { %631 = vmatprep.subr.bf16.mxu0 %v909_v0  ;;  %639 = vmatprep.subr.bf16.mxu1 %v909_v0  ;;  %v618_v22 = vld [vmem:[%s1141_s4] ss:$0 sm:$0xff]  ;;  %s818_s10 = scalar_lea.vmem %s1091_s27, 128  ;;  %s911_s21 = smov [#allocation9]  }
  0x51   : > { %p819_p8 = scmp.ne.s32.totalorder %s1091_s27, %s818_s10  ;;  %s822_s13 = sshll.u32 %s911_s21, 4  ;;  %s823_s13 = int_to_ptr.vmem [resolvable:$false] %s822_s13 }
  0x52   : > { %s824_s14 = scalar_lea.vmem %s823_s13, 256  ;;  %p825_p2 = scmp.lt.s32.totalorder %s1091_s27, %s823_s13 }
  0x53   : > { %632 = vmatpush3.bf16.msra.mxu0 %v733_v2  ;;  %640 = vmatpush3.bf16.msra.mxu1 %v735_v5  ;;  %p820_p9 = pnand %p819_p8, %p1037_p7  ;;  %p826_p13 = scmp.lt.s32.totalorder %s824_s14, %s818_s10 }
  0x55   : > { %p821_p11 = pneg %p820_p9  ;;  %p827_p0 = por %p826_p13, %p825_p2 }
  0x56   : > { %634 = vmatmul.mubr.msk.bf16.vlgmr.msra.gmra.mxu0 %vm341_vm1, %v317_v3 }
  0x57   : > { %p828_p5 = pnand %p827_p0, %p821_p11 }
 0x116   : > { %v379_v7 = vpop.f32.mrf.mxu0 }
 0x117   : > { %v380_v8 = vadd.f32 %v611_v6, %v379_v7 }
 0x118   : > { %v635_v9 = vpop.f32.mrf.mxu0 }
 0x119   : > { %v386_v10 = vmul.f32 %v380_v8, %v380_v8  ;;  %v385_v18 = vmul.f32 0.5, %v380_v8 }
 0x11a   : > { %v382_v11 = vpop.f32.mrf.mxu0 }
 0x11b   : > { %v387_v12 = vmul.f32 %v386_v10, %v380_v8 }
 0x11c   : > { %v636_v13 = vpop.f32.mrf.mxu0 }
 0x11d   : > { %v388_v14 = vmul.f32 0.044715, %v387_v12 }
 0x11f   : > { %v389_v15 = vadd.f32 %v388_v14, %v380_v8 }
 0x121   : > { %v390_v16 = vmul.f32 0.7978846, %v389_v15 }
 0x123   : > { %736 = vtanh.f32 %v390_v16 }
 0x130   : > { %v737_v17 = vpop.eup %736 }
 0x131   : > { %v392_v19 = vadd.f32 1.0, %v737_v17 }
 0x133   : > { %v393_v20 = vmul.f32 %v392_v19, %v385_v18 }
 0x135   : > { %v395_v21 = vpack.c.bf16 %v393_v20, %v393_v20 }
 0x137   : > { %642 = vmatmul.mubr.msk.bf16.vlgmr.msra.gmra.mxu1 %vm341_vm1, %v395_v21 }
 0x1f7   : > { %v449_v23 = vpop.f32.mrf.mxu1 }
 0x1f8   : > { %v468_v24 = vadd.f32 %v618_v22, %v449_v23 }
 0x1f9   : > { %v643_v25 = vpop.f32.mrf.mxu1 }
 0x1fa   : > { %469 = vst [vmem:[%s306_s17] sm:$0xff] %v468_v24 }
 0x1fb   : > { %v452_v26 = vpop.f32.mrf.mxu1 }
 0x1fc   : > { %831 = shalt.err (!%p828_p5)
}
 0x1fd   : > { %s832_s1 = scalar_lea.hbm %s1089_s6, 128  ;;  %s836_s28 = scalar_lea.hbm %s1142_s5, 256 }
 0x1fe   : > { %p833_p10 = scmp.ne.s32.totalorder %s1089_s6, %s832_s1  ;;  %p837_p6 = scmp.lt.s32.totalorder %s1089_s6, %s1142_s5 }
 0x1ff   : > { %p838_p12 = scmp.lt.s32.totalorder %s836_s28, %s832_s1 }
 0x200   : > { %p834_p1 = pnand %p833_p10, %p1037_p7 }
 0x201   : > { %p839_p3 = por %p838_p12, %p837_p6 }
 0x202   : > { %p835_p4 = pneg %p834_p1 }
 0x204   : > { %p840_p8 = pnand %p839_p3, %p835_p4 }
 0x206   : > { %843 = shalt.err (!%p840_p8)
}
 0x207   : > { %655 = dma.vmem_to_hbm [thread:$0]  (%p1037_p7), %s1091_s27, 128, %s1089_s6, %s471_s11   ;;  %v644_v27 = vpop.f32.mrf.mxu1 }
 0x208 PF: > { %s496_s16 = sand.u32 1, %s882_s18   ;;  %p1158_p9 = scmp.ne.s32.totalorder %s1150_s29, 0 }
 0x209   : > { %p1159_p11 = scmp.ge.s32.totalorder %s902_s23, 2  ;;  %s497_s17 = scalar_lea.sflag [#allocation5], %s496_s16 }
 0x20b   : > { %p669_p2 = pnand %p1159_p11, %p1158_p9 }
 0x20d   : > { %p670_p13 = pneg %p669_p2 }
 0x20f   : > { %877 = dma.done.wait (%p670_p13), %s497_s17, 128  }
 0x210   : > { %879 = vsyncadd (%p670_p13), %s497_s17, 4294967168  ;;  %s22_s23 = sadd.s32 1, %s902_s23   ;;  %s1160_s18 = smov %s886_s19 }
 0x211   : > { %p19_p0 = scmp.ge.s32.totalorder %s22_s23, 4   ;;  %s1161_s19 = smov %s890_s20 }
 0x212   : > { %s1162_s20 = smov %s1046_s12  ;;  %s1163_s21 = smov %s898_s22 }
 0x213   : > { %s1164_s22 = smov %s1166_s25  ;;  %21 = sbr.rel (!%p19_p0) target bundleno = 9 (0x9), region = 106 }
 0x218   :  { %502 = vsyncpa [#allocation4], 1 }
 0x219   :  { %504 = vsyncpa [#allocation4 + $0x1], 1 }
 0x21a   :  { %505 = vsyncpa [#allocation7], 1 }
 0x21b   :  { %506 = vsyncpa [#allocation5], 1 }
 0x21c   :  { %508 = vsyncpa [#allocation5 + $0x1], 1 }

</bundles_post_ra>
